<compile_context>
chip_gen: v7x
topology: tpu7x:2x2x1
jax: 0.10.0
libtpu: 0.0.40
codegen_flags: <defaults>
</compile_context>

<pallas_src>
import jax
import jax.numpy as jnp
from jax import lax
from jax.experimental import pallas as pl
from jax.experimental.pallas import tpu as pltpu

_TARGET_BLOCK_BYTES = 2 * 1024 * 1024   # per-input block (double buffered)
_VMEM_LIMIT_BYTES = 32 * 1024 * 1024    # 3 inputs x 2 bufs x 2 MiB + acc << 32 MiB


def _round_up(x, m):
    return ((x + m - 1) // m) * m


def _make_kernel(tile_rows, height, need_mask):
    def kernel(vis_ref, ir_ref, gen_ref, out_ref, acc_ref):
        b = pl.program_id(0)
        h = pl.program_id(1)

        @pl.when((b == 0) & (h == 0))
        def _():
            acc_ref[...] = jnp.zeros_like(acc_ref)

        # Native-dtype compute (bf16 native on v6e/v7x), f32 accumulation.
        cdt = jnp.promote_types(
            jnp.promote_types(vis_ref.dtype, ir_ref.dtype), gen_ref.dtype)
        vis = vis_ref[...].astype(cdt)
        ir = ir_ref[...].astype(cdt)
        gen = gen_ref[...].astype(cdt)
        d = jnp.abs(gen - jnp.maximum(vis, ir)).astype(jnp.float32)  # (TH, W)

        if need_mask:
            # Ragged H tail: partial input blocks are NOT zero-filled, so mask
            # the rows that fall past the real image height.
            rows = lax.broadcasted_iota(jnp.int32, d.shape, 0) + h * tile_rows
            d = jnp.where(rows < height, d, 0.0)

        # Fold the block into the small (8, W) accumulator: pure VALU adds,
        # no full-tile accumulator load/store traffic.
        acc_ref[...] += jnp.sum(
            d.reshape(tile_rows // 8, 8, d.shape[-1]), axis=0)

        @pl.when((b == pl.num_programs(0) - 1) & (h == pl.num_programs(1) - 1))
        def _():
            out_ref[0, 0] = jnp.sum(acc_ref[...])

    return kernel


def maxfusion_loss(image_vis, image_ir, generate_img, loss_weight=1.0):
    """Pallas implementation of MaxFusionloss.forward (reduction='mean')."""
    if image_ir.ndim == 3:                    # (B, H, W) -> (B, 1, H, W)
        image_ir = image_ir[:, None]

    B, _, H, W = image_vis.shape
    ir_B = image_ir.shape[0]
    assert image_ir.shape[-2:] == (H, W), "image_ir spatial dims must match"
    assert generate_img.shape[-2:] == (H, W), "generate_img spatial dims must match"
    assert ir_B in (1, B), "image_ir batch must be 1 or B"

    n_elems = B * H * W

    # --- tile selection: TH rows (multiple of 8) x full W (~2 MiB / block) ---
    itemsize = max(image_vis.dtype.itemsize, image_ir.dtype.itemsize,
                   generate_img.dtype.itemsize)
    rows_cap = max(8, (_TARGET_BLOCK_BYTES // max(1, W * itemsize)) // 8 * 8)
    tile_rows = min(_round_up(H, 8), rows_cap)
    num_h_blocks = pl.cdiv(H, tile_rows)
    need_mask = (H % tile_rows) != 0

    kernel = _make_kernel(tile_rows, H, need_mask)

    # Channel block pinned to 0 selects the Y plane; batch/channel dims are
    # squeezed so the kernel sees contiguous (tile_rows, W) tiles.
    vis_spec = pl.BlockSpec((None, None, tile_rows, W), lambda b, h: (b, 0, h, 0))
    gen_spec = pl.BlockSpec((None, None, tile_rows, W), lambda b, h: (b, 0, h, 0))
    if ir_B == 1:
        # Batch-broadcast IR plane: read batch block 0 every step, no copies.
        ir_spec = pl.BlockSpec((None, None, tile_rows, W), lambda b, h: (0, 0, h, 0))
    else:
        ir_spec = pl.BlockSpec((None, None, tile_rows, W), lambda b, h: (b, 0, h, 0))
    out_spec = pl.BlockSpec((1, 1), lambda b, h: (0, 0), memory_space=pltpu.SMEM)

    cost = pl.CostEstimate(
        flops=4 * n_elems,
        transcendentals=0,
        bytes_accessed=int(
            n_elems * (image_vis.dtype.itemsize + image_ir.dtype.itemsize
                       + generate_img.dtype.itemsize) + 4),
    )

    total = pl.pallas_call(
        kernel,
        out_shape=jax.ShapeDtypeStruct((1, 1), jnp.float32),
        grid_spec=pltpu.PrefetchScalarGridSpec(
            num_scalar_prefetch=0,
            grid=(B, num_h_blocks),
            in_specs=[vis_spec, ir_spec, gen_spec],
            out_specs=out_spec,
            scratch_shapes=[pltpu.VMEM((8, W), jnp.float32)],
        ),
        compiler_params=pltpu.CompilerParams(
            dimension_semantics=("arbitrary", "arbitrary"),
            vmem_limit_bytes=_VMEM_LIMIT_BYTES,
        ),
        cost_estimate=cost,
    )(image_vis, image_ir, generate_img)[0, 0]

    return jnp.float32(loss_weight) * total / jnp.float32(n_elems)


if __name__ == "__main__":
    key = jax.random.PRNGKey(0)
    k1, k2, k3 = jax.random.split(key, 3)

    B, C, H, W = 2, 4, 16, 16
    image_vis = jax.random.uniform(k1, (B, C, H, W), dtype=jnp.float32)
    image_ir = jax.random.uniform(k2, (B, 1, H, W), dtype=jnp.float32)
    generate_img = jax.random.uniform(k3, (B, C, H, W), dtype=jnp.float32)

    loss = maxfusion_loss(image_vis, image_ir, generate_img, loss_weight=1.0)
    loss = jax.block_until_ready(loss)

    # pure-JAX reference check (matches F.l1_loss(gen_y, max(vis_y, ir)))
    ref = jnp.mean(
        jnp.abs(generate_img[:, :1] - jnp.maximum(image_vis[:, :1], image_ir)))
    assert jnp.allclose(loss, ref, rtol=1e-5, atol=1e-6), (loss, ref)

    print("KERNEL_OK")
</pallas_src>

<mosaic_0001>
module attributes {stable_mosaic.version = 11 : i64} {
  func.func @kernel(%arg0: i32, %arg1: i32, %arg2: memref<1x1x16x16xf32, #tpu.memory_space<vmem>>, %arg3: memref<1x1x16x16xf32, #tpu.memory_space<vmem>>, %arg4: memref<1x1x16x16xf32, #tpu.memory_space<vmem>>, %arg5: memref<1x1xf32, #tpu.memory_space<smem>>, %arg6: memref<8x16xf32, #tpu.memory_space<vmem>>) attributes {dimension_semantics = [#tpu.dimension_semantics<arbitrary>, #tpu.dimension_semantics<arbitrary>], iteration_bounds = array<i64: 2, 1>, scalar_prefetch = 0 : i64, scratch_operands = 1 : i64, tpu.core_type = #tpu.core_type<tc>, window_params = [{transform_indices = @transform_0, window_bounds = array<i64: 1, 1, 16, 16>}, {transform_indices = @transform_1, window_bounds = array<i64: 1, 1, 16, 16>}, {transform_indices = @transform_2, window_bounds = array<i64: 1, 1, 16, 16>}, {transform_indices = @transform_3, window_bounds = array<i64: 1, 1>}]} {
    %c0_i32 = arith.constant 0 : i32
    %0 = arith.cmpi eq, %arg0, %c0_i32 : i32
    %c0_i32_0 = arith.constant 0 : i32
    %1 = arith.cmpi eq, %arg1, %c0_i32_0 : i32
    %2 = arith.andi %0, %1 : i1
    %3 = arith.extui %2 : i1 to i32
    %c0_i32_1 = arith.constant 0 : i32
    %4 = arith.cmpi ne, %3, %c0_i32_1 : i32
    scf.if %4 {
      %cst_19 = arith.constant 0.000000e+00 : f32
      %24 = vector.broadcast %cst_19 : f32 to vector<8x16xf32>
      %c0_20 = arith.constant 0 : index
      %c0_21 = arith.constant 0 : index
      %25 = vector.load %arg6[%c0_20, %c0_21] : memref<8x16xf32, #tpu.memory_space<vmem>>, vector<8x16xf32>
      tpu.vector_store %arg6[%c0_20, %c0_21], %24 {strides = array<i32>} : memref<8x16xf32, #tpu.memory_space<vmem>>, vector<8x16xf32>,
    } else {
    }
    %c0 = arith.constant 0 : index
    %c0_2 = arith.constant 0 : index
    %c0_3 = arith.constant 0 : index
    %c0_4 = arith.constant 0 : index
    %5 = vector.load %arg2[%c0, %c0_2, %c0_3, %c0_4] : memref<1x1x16x16xf32, #tpu.memory_space<vmem>>, vector<1x1x16x16xf32>
    %6 = vector.shape_cast %5 : vector<1x1x16x16xf32> to vector<16x16xf32>
    %c0_5 = arith.constant 0 : index
    %c0_6 = arith.constant 0 : index
    %c0_7 = arith.constant 0 : index
    %c0_8 = arith.constant 0 : index
    %7 = vector.load %arg3[%c0_5, %c0_6, %c0_7, %c0_8] : memref<1x1x16x16xf32, #tpu.memory_space<vmem>>, vector<1x1x16x16xf32>
    %8 = vector.shape_cast %7 : vector<1x1x16x16xf32> to vector<16x16xf32>
    %c0_9 = arith.constant 0 : index
    %c0_10 = arith.constant 0 : index
    %c0_11 = arith.constant 0 : index
    %c0_12 = arith.constant 0 : index
    %9 = vector.load %arg4[%c0_9, %c0_10, %c0_11, %c0_12] : memref<1x1x16x16xf32, #tpu.memory_space<vmem>>, vector<1x1x16x16xf32>
    %10 = vector.shape_cast %9 : vector<1x1x16x16xf32> to vector<16x16xf32>
    %11 = arith.maximumf %6, %8 : vector<16x16xf32>
    %12 = arith.subf %10, %11 : vector<16x16xf32>
    %13 = math.absf %12 : vector<16x16xf32>
    %c0_13 = arith.constant 0 : index
    %c0_14 = arith.constant 0 : index
    %14 = vector.load %arg6[%c0_13, %c0_14] : memref<8x16xf32, #tpu.memory_space<vmem>>, vector<8x16xf32>
    %15 = vector.shape_cast %13 : vector<16x16xf32> to vector<2x8x16xf32>
    %cst = arith.constant dense<0.000000e+00> : vector<8x16xf32>
    %16 = vector.multi_reduction <add>, %15, %cst [0] : vector<2x8x16xf32> to vector<8x16xf32>
    %17 = arith.addf %14, %16 : vector<8x16xf32>
    %c0_15 = arith.constant 0 : index
    %c0_16 = arith.constant 0 : index
    %18 = vector.load %arg6[%c0_15, %c0_16] : memref<8x16xf32, #tpu.memory_space<vmem>>, vector<8x16xf32>
    tpu.vector_store %arg6[%c0_15, %c0_16], %17 {strides = array<i32>} : memref<8x16xf32, #tpu.memory_space<vmem>>, vector<8x16xf32>,
    %c1_i32 = arith.constant 1 : i32
    %19 = arith.cmpi eq, %arg0, %c1_i32 : i32
    %c0_i32_17 = arith.constant 0 : i32
    %20 = arith.cmpi eq, %arg1, %c0_i32_17 : i32
    %21 = arith.andi %19, %20 : i1
    %22 = arith.extui %21 : i1 to i32
    %c0_i32_18 = arith.constant 0 : i32
    %23 = arith.cmpi ne, %22, %c0_i32_18 : i32
    scf.if %23 {
      %c0_19 = arith.constant 0 : index
      %c0_20 = arith.constant 0 : index
      %24 = vector.load %arg6[%c0_19, %c0_20] : memref<8x16xf32, #tpu.memory_space<vmem>>, vector<8x16xf32>
      %25 = vector.shape_cast %24 : vector<8x16xf32> to vector<1x8x16xf32>
      %cst_21 = arith.constant dense<0.000000e+00> : vector<1xf32>
      %26 = vector.multi_reduction <add>, %25, %cst_21 [1, 2] : vector<1x8x16xf32> to vector<1xf32>
      %27 = vector.shape_cast %26 : vector<1xf32> to vector<1x1x1xf32>
      %28 = vector.extract %27[0, 0, 0] : f32 from vector<1x1x1xf32>
      %c0_22 = arith.constant 0 : index
      %c0_23 = arith.constant 0 : index
      %29 = memref.load %arg5[%c0_22, %c0_23] : memref<1x1xf32, #tpu.memory_space<smem>>
      memref.store %28, %arg5[%c0_22, %c0_23] : memref<1x1xf32, #tpu.memory_space<smem>>
    } else {
    }
    return
  }
  func.func @transform_0(%arg0: i32, %arg1: i32) -> (i32, i32, i32, i32) {
    %c0_i32 = arith.constant 0 : i32
    %c0_i32_0 = arith.constant 0 : i32
    %c0_i32_1 = arith.constant 0 : i32
    return %arg0, %c0_i32, %arg1, %c0_i32_0 : i32, i32, i32, i32
  }
  func.func @transform_1(%arg0: i32, %arg1: i32) -> (i32, i32, i32, i32) {
    %c0_i32 = arith.constant 0 : i32
    %c0_i32_0 = arith.constant 0 : i32
    %c0_i32_1 = arith.constant 0 : i32
    return %arg0, %c0_i32, %arg1, %c0_i32_0 : i32, i32, i32, i32
  }
  func.func @transform_2(%arg0: i32, %arg1: i32) -> (i32, i32, i32, i32) {
    %c0_i32 = arith.constant 0 : i32
    %c0_i32_0 = arith.constant 0 : i32
    %c0_i32_1 = arith.constant 0 : i32
    return %arg0, %c0_i32, %arg1, %c0_i32_0 : i32, i32, i32, i32
  }
  func.func @transform_3(%arg0: i32, %arg1: i32) -> (i32, i32) {
    %c0_i32 = arith.constant 0 : i32
    %c0_i32_0 = arith.constant 0 : i32
    %c0_i32_1 = arith.constant 0 : i32
    return %c0_i32, %c0_i32_0 : i32, i32
  }
}

</mosaic_0001>

<bundles_post_ra>
// kernel: tpu_custom_call.1
= control target key start
LH: loop header
LB: loop body
LE: loop exit
PB: predicated region body
PF: predicated region fallthrough
CT: control target
= control target key end

     0   :  { %8 = vsyncpa [#allocation4], 0  ;;  %s968_s0 = inlined_call_operand.hbm [shape: f32[2,4,16,16], index: 0, kind: input, shape index: {}]   ;;  %s969_s1 = inlined_call_operand.hbm [shape: f32[2,1,16,16], index: 1, kind: input, shape index: {}]   ;;  %s970_s2 = inlined_call_operand.hbm [shape: f32[2,4,16,16], index: 2, kind: input, shape index: {}]   ;;  %s971_s3 = inlined_call_operand.hbm [shape: f32[1,1], index: 3, kind: output, shape index: {}]  }
   0x1   :  { %10 = vsyncpa [#allocation4 + $0x1], 0 }
   0x2   :  { %11 = vsyncpa [#allocation7], 0 }
   0x3   :  { %13 = vsyncpa [#allocation7 + $0x1], 0 }
   0x4   :  { %14 = vsyncpa [#allocation5], 0  ;;  %s736_s12 = smov 0   ;;  %s738_s13 = smov 0  }
   0x5   :  { %s740_s14 = smov 0   ;;  %s742_s15 = smov 0  }
   0x6   :  { %s744_s16 = smov 0   ;;  %s746_s17 = smov 0  }
   0x7 LB: > { %s765_s18 = sadd.s32 4294967295, %s707_s17   ;;  %s32_s19 = sadd.s32 1, %s703_s16  ;;  %s707_s17 = sphi %s746_s17, %s20_s17   ;;  %s703_s16 = sphi %s744_s16, %s984_s16   ;;  %s699_s15 = sphi %s742_s15, %s983_s15   ;;  %s695_s14 = sphi %s740_s14, %s982_s14   ;;  %s691_s13 = sphi %s738_s13, %s981_s13   ;;  %s687_s12 = sphi %s736_s12, %s980_s12  }
   0x8   : > { %p34_p0 = scmp.ge.s32.totalorder %s32_s19, 2  ;;  %s41_s20 = sadd.s32 1, %s695_s14 }
   0x9   : > { %p48_p1 = scmp.ne.s32.totalorder %s695_s14, %s691_s13  ;;  %p49_p2 = scmp.eq.s32.totalorder %s707_s17, 0 }
   0xa   : > { %s986_s19 = smov (%p34_p0, %s32_s19), 0  ;;  %p54_p4 = scmp.ne.s32.totalorder %s691_s13, %s687_s12 }
   0xb   : > { %p50_p3 = por %p49_p2, %p48_p1  ;;  %s36_s21 = ssub.s32 %s703_s16, %s986_s19 }
   0xc   : > { %p55_p5 = scmp.eq.s32.totalorder %s765_s18, 0  ;;  %p39_p6 = scmp.eq.s32.totalorder %s36_s21, 0 }
   0xd   : > { %p492_p8 = scmp.lt.s32.totalorder %s707_s17, 2  ;;  %s155_s24 = sand.u32 1, %s695_s14  }
   0xe   : > { %p778_p7 = por %p55_p5, %p54_p4  ;;  %s793_s26 = sshll.u32 %s155_s24, 4 }
   0xf   : > { %s784_s23 = scalar_select %p39_p6, %s695_s14, %s41_s20  }
  0x10   : > { %s973_s22 = scalar_select %p778_p7, 1, 0 }
  0x11   : > { %p787_p9 = pnand %p492_p8, %p50_p3  ;;  %s178_s27 = sand.u32 1, %s707_s17  }
  0x12   : > { %s466_s28 = sshll.u32 %s703_s16, 8  ;;  %s182_s5 = scalar_lea.vmem [#allocation6], %s793_s26 }
  0x13   : > { %s800_s4 = scalar_lea.hbm %s969_s1, %s466_s28  ;;  %s191_s6 = sshll.u32 %s182_s5, 4  ;;  %s803_s6 = int_to_ptr.vmem [resolvable:$true] %s191_s6 }
  0x14   : > { %s806_s7 = scalar_lea.sflag [#allocation7], %s178_s27  ;;  %s547_s8 = scalar_lea.hbm %s800_s4, 256 }
  0x15   : > { %p548_p11 = scmp.ne.s32.totalorder %s800_s4, %s547_s8  ;;  %p812_p12 = pneg %p787_p9 }
  0x16   : > { %s552_s12 = scalar_lea.hbm %s969_s1, 512  ;;  %p553_p1 = scmp.lt.u32.totalorder %s800_s4, %s969_s1 }
  0x17   : > { %p550_p13 = pnand %p812_p12, %p548_p11  ;;  %p554_p2 = scmp.lt.u32.totalorder %s552_s12, %s547_s8 }
  0x18   : > { %p556_p4 = scmp.lt.u32.totalorder %s547_s8, %s800_s4 }
  0x19   : > { %p551_p0 = pneg %p550_p13  ;;  %p555_p3 = por %p554_p2, %p553_p1 }
  0x1b   : > { %p557_p5 = por %p556_p4, %p555_p3 }
  0x1d   : > { %p558_p6 = pnand %p557_p5, %p551_p0 }
  0x1f   : > { %561 = shalt.err (!%p558_p6)
}
  0x20   : > { %s562_s27 = scalar_lea.vmem %s803_s6, 256  ;;  %s709_s28 = smov [#allocation6]  }
  0x21   : > { %p563_p8 = scmp.ne.s32.totalorder %s803_s6, %s562_s27  ;;  %s567_s29 = sshll.u32 %s709_s28, 4  ;;  %s568_s29 = int_to_ptr.vmem [resolvable:$false] %s567_s29 }
  0x22   : > { %s569_s30 = scalar_lea.vmem %s568_s29, 512  ;;  %p570_p10 = scmp.lt.s32.totalorder %s803_s6, %s568_s29 }
  0x23   : > { %p565_p11 = pnand %p563_p8, %p812_p12  ;;  %p571_p7 = scmp.lt.s32.totalorder %s569_s30, %s562_s27 }
  0x25   : > { %p566_p13 = pneg %p565_p11  ;;  %p572_p1 = por %p571_p7, %p570_p10 }
  0x27   : > { %p573_p2 = pnand %p572_p1, %p566_p13 }
  0x29   : > { %576 = shalt.err (!%p573_p2)
}
  0x2a   : > { %s710_s5 = smov 128   ;;  %s711_s8 = smov 8  }
  0x2b   : > { %488 = dma.hbm_to_vmem [thread:$0]  (!%p787_p9), %s800_s4, 256, %s803_s6, %s806_s7, %s710_s5, %s710_s5, %s711_s8  }
  0x2c   : > { %p222_p7 = scmp.lt.s32.totalorder %s707_s17, 3  ;;  %p976_p10 = scmp.ge.s32.totalorder %s707_s17, 1 }
  0x2d   : > { %s465_s11 = sshll.u32 %s703_s16, 10  ;;  %s159_s12 = scalar_lea.vmem [#allocation3], %s793_s26 }
  0x2e   : > { %p842_p0 = pnand %p976_p10, %p222_p7  ;;  %s168_s20 = sshll.u32 %s159_s12, 4  ;;  %s855_s20 = int_to_ptr.vmem [resolvable:$true] %s168_s20 }
  0x2f   : > { %s853_s28 = scalar_lea.hbm %s968_s0, %s465_s11  ;;  %s859_s4 = scalar_lea.sflag [#allocation4], %s155_s24 }
  0x30   : > { %s977_s10 = scalar_select %p842_p0, 1, 0 }
  0x31   : > { %s577_s6 = scalar_lea.hbm %s853_s28, 256  ;;  %s582_s12 = scalar_lea.hbm %s968_s0, 2048 }
  0x32   : > { %p578_p3 = scmp.ne.s32.totalorder %s853_s28, %s577_s6  ;;  %p583_p6 = scmp.lt.u32.totalorder %s853_s28, %s968_s0 }
  0x33   : > { %p584_p8 = scmp.lt.u32.totalorder %s582_s12, %s577_s6  ;;  %p586_p13 = scmp.lt.u32.totalorder %s577_s6, %s853_s28 }
  0x34   : > { %p580_p4 = pnand %p578_p3, %p812_p12 }
  0x35   : > { %p585_p11 = por %p584_p8, %p583_p6 }
  0x36   : > { %p581_p5 = pneg %p580_p4 }
  0x37   : > { %p587_p1 = por %p586_p13, %p585_p11 }
  0x39   : > { %p588_p2 = pnand %p587_p1, %p581_p5 }
  0x3b   : > { %591 = shalt.err (!%p588_p2)
}
  0x3c   : > { %s592_s24 = scalar_lea.vmem %s855_s20, 256  ;;  %s712_s29 = smov [#allocation3]  }
  0x3d   : > { %p593_p7 = scmp.ne.s32.totalorder %s855_s20, %s592_s24  ;;  %s597_s30 = sshll.u32 %s712_s29, 4  ;;  %s598_s30 = int_to_ptr.vmem [resolvable:$false] %s597_s30 }
  0x3e   : > { %s599_s21 = scalar_lea.vmem %s598_s30, 512  ;;  %p600_p4 = scmp.lt.s32.totalorder %s855_s20, %s598_s30 }
  0x3f   : > { %p595_p10 = pnand %p593_p7, %p812_p12  ;;  %p601_p0 = scmp.lt.s32.totalorder %s599_s21, %s592_s24 }
  0x41   : > { %p596_p3 = pneg %p595_p10  ;;  %p602_p6 = por %p601_p0, %p600_p4 }
  0x43   : > { %p603_p8 = pnand %p602_p6, %p596_p3 }
  0x45   : > { %606 = shalt.err (!%p603_p8)
}
  0x46   : > { %485 = dma.hbm_to_vmem [thread:$0]  (!%p787_p9), %s853_s28, 256, %s855_s20, %s859_s4, %s710_s5, %s710_s5, %s711_s8  }
  0x47   : > { %s891_s27 = scalar_lea.hbm %s970_s2, %s465_s11  ;;  %s205_s24 = scalar_lea.vmem [#allocation8], %s793_s26 }
  0x48   : > { %s214_s29 = sshll.u32 %s205_s24, 4  ;;  %s607_s30 = scalar_lea.hbm %s891_s27, 256  ;;  %s894_s29 = int_to_ptr.vmem [resolvable:$true] %s214_s29 }
  0x49   : > { %p608_p0 = scmp.ne.s32.totalorder %s891_s27, %s607_s30  ;;  %s612_s4 = scalar_lea.hbm %s970_s2, 2048 }
  0x4a   : > { %p613_p13 = scmp.lt.u32.totalorder %s891_s27, %s970_s2  ;;  %p614_p1 = scmp.lt.u32.totalorder %s612_s4, %s607_s30 }
  0x4b   : > { %p610_p5 = pnand %p608_p0, %p812_p12  ;;  %p616_p7 = scmp.lt.u32.totalorder %s607_s30, %s891_s27 }
  0x4c   : > { %p615_p2 = por %p614_p1, %p613_p13 }
  0x4d   : > { %p611_p11 = pneg %p610_p5 }
  0x4e   : > { %p617_p10 = por %p616_p7, %p615_p2 }
  0x50   : > { %p618_p3 = pnand %p617_p10, %p611_p11 }
  0x52   : > { %621 = shalt.err (!%p618_p3)
}
  0x53   : > { %s622_s26 = scalar_lea.vmem %s894_s29, 256  ;;  %s713_s6 = smov [#allocation8]  }
  0x54   : > { %p623_p4 = scmp.ne.s32.totalorder %s894_s29, %s622_s26  ;;  %s627_s12 = sshll.u32 %s713_s6, 4  ;;  %s628_s12 = int_to_ptr.vmem [resolvable:$false] %s627_s12 }
  0x55   : > { %s629_s24 = scalar_lea.vmem %s628_s12, 512  ;;  %p630_p0 = scmp.lt.s32.totalorder %s894_s29, %s628_s12 }
  0x56   : > { %p625_p6 = pnand %p623_p4, %p812_p12  ;;  %p631_p5 = scmp.lt.s32.totalorder %s629_s24, %s622_s26 }
  0x58   : > { %p626_p8 = pneg %p625_p6  ;;  %p632_p13 = por %p631_p5, %p630_p0 }
  0x5a   : > { %p633_p1 = pnand %p632_p13, %p626_p8 }
  0x5c   : > { %636 = shalt.err (!%p633_p1)
}
  0x5d   : > { %491 = dma.hbm_to_vmem [thread:$0]  (!%p787_p9), %s891_s27, 256, %s894_s29, %s806_s7, %s710_s5, %s710_s5, %s711_s8  }
  0x5e   : > { %p978_p12 = scmp.ne.s32.totalorder %s977_s10, 0 }
  0x5f   : > { %s228_s9 = sand.u32 (!%p978_p12), 1, %s691_s13   ;;  %p979_p11 = scmp.ne.s32.totalorder (!%p978_p12), %s973_s22, 0 }
  0x60   : > { %226 = sbr.rel (%p978_p12) target bundleno = 358 (0x166), region = 32  ;;  %s456_s30 = sshll.u32 (!%p978_p12), %s228_s9, 4 }
  0x61   : > { %s229_s20 = scalar_lea.sflag (!%p978_p12), [#allocation4], %s228_s9  ;;  %s232_s28 = scalar_lea.vmem (!%p978_p12), [#allocation3], %s456_s30 }
  0x67   : > { %674 = dma.done.wait (%p979_p11), %s229_s20, 256  }
  0x68   : > { %676 = vsyncadd (%p979_p11), %s229_s20, 4294967040  ;;  %s237_s25 = sand.u32 1, %s765_s18   ;;  %s241_s21 = scalar_lea.vmem [#allocation6], %s456_s30 }
  0x69   : > { %s238_s4 = scalar_lea.sflag [#allocation7], %s237_s25 }
  0x6a   : > { %678 = dma.done.wait (%p979_p11), %s238_s4, 512  }
  0x6b   : > { %680 = vsyncadd (%p979_p11), %s238_s4, 4294966784  ;;  %p281_p9 = scmp.eq.s32.totalorder %s699_s15, 0  ;;  %s250_s7 = scalar_lea.vmem [#allocation8], %s456_s30 }
  0x6c   : > { %vm287_vm0 = vcmask (%p281_p9), 130048   ;;  %v714_v0 = vmov (%p281_p9), 0.0  }
  0x6d   : > { %286 = sbr.rel (!%p281_p9) target bundleno = 116 (0x74), region = 48  ;;  %288 = vst.msk [vmem:[#allocation2] sm:$0xff] (%p281_p9), %vm287_vm0, %v714_v0 }
  0x74 PF: > { %v289_v1 = vld [vmem:[%s232_s28] sm:$0xff]  ;;  %v290_v2 = vld [vmem:[%s232_s28 + $0x8] sm:$0xff]  ;;  %p308_p2 = scmp.eq.s32.totalorder %s699_s15, 1  ;;  %vm302_vm1 = vcmask 130048  }
  0x75   : > { %v291_v3 = vld [vmem:[%s241_s21] sm:$0xff]  ;;  %v292_v4 = vld [vmem:[%s241_s21 + $0x8] sm:$0xff] }
  0x76   : > { %v293_v5 = vld [vmem:[%s250_s7] sm:$0xff]  ;;  %v294_v6 = vld [vmem:[%s250_s7 + $0x8] sm:$0xff]  ;;  %v295_v7 = vmax.f32 %v289_v1, %v291_v3  ;;  %v296_v8 = vmax.f32 %v290_v2, %v292_v4 }
  0x77   : > { %v301_v14 = vld [vmem:[#allocation2] sm:$0xff] }
  0x78   : > { %v297_v9 = vsub.f32 %v293_v5, %v295_v7  ;;  %v298_v10 = vsub.f32 %v294_v6, %v296_v8 }
  0x7a   : > { %v299_v11 = vand.u32 2147483647, %v297_v9  ;;  %v300_v12 = vand.u32 2147483647, %v298_v10 }
  0x7b   : > { %312 = sbr.rel (!%p308_p2) target bundleno = 343 (0x157), region = 52 }
  0x7c   : > { %v303_v13 = vsel %vm302_vm1, %v299_v11, 0.0  ;;  %v304_v15 = vsel %vm302_vm1, %v300_v12, 0.0 }
  0x7d   : > { %v305_v16 = vadd.f32 %v304_v15, %v303_v13 }
  0x7f   : > { %v306_v17 = vadd.f32 %v305_v16, %v301_v14 }
  0x81   : > { %307 = vst.msk [vmem:[#allocation2] sm:$0xff] %vm302_vm1, %v306_v17 }
  0x88   : > { %v313_v18 = vld [vmem:[#allocation2] sm:$0xff] }
  0x89   : > { %v314_v19 = vsel %vm302_vm1, %v313_v18, 0.0 }
  0x8a   : > { %315 = vadd.xlane.f32.xlu0 %v314_v19 }
 0x117   : > { %v316_v20 = vpop.xlane.xlu0 %315 }
 0x118   : > { %v317_v21 = vrot.slane %v316_v20, 4 }
 0x11a   : > { %v318_v22 = vadd.f32 %v317_v21, %v316_v20 }
 0x11c   : > { %v319_v23 = vrot.slane %v318_v22, 2 }
 0x11e   : > { %v320_v24 = vadd.f32 %v319_v23, %v318_v22 }
 0x120   : > { %v321_v25 = vrot.slane %v320_v24, 1 }
 0x122   : > { %v322_v26 = vadd.f32 %v321_v25, %v320_v24 }
 0x124   : > { %470 = vpush %v322_v26 }
 0x155   : > { %s471_s22 = spop %470 }
 0x156   : > { %325 = sst [smem:[#allocation9]] %s471_s22 }
 0x157 PF: > { %p493_p7 = scmp.eq.s32.totalorder %s765_s18, 1  ;;  %s637_s15 = scalar_lea.hbm %s971_s3, 16 }
 0x158   : > { %p638_p10 = scmp.ne.s32.totalorder %s971_s3, %s637_s15  ;;  %p643_p6 = scmp.lt.u32.totalorder %s637_s15, %s971_s3 }
 0x15a   : > { %p639_p3 = pnand %p638_p10, %p493_p7 }
 0x15c   : > { %p640_p4 = pneg %p639_p3 }
 0x15e   : > { %p645_p8 = pnand %p643_p6, %p640_p4 }
 0x160   : > { %648 = shalt.err (!%p645_p8)
}
 0x161   : > { %s715_s26 = smov [#allocation9]  }
 0x162   : > { %479 = dma.smem_to_hbm (%p493_p7), %s715_s26, 16, %s971_s3, [#allocation5]  }
 0x163   : > { %682 = dma.done.wait (%p493_p7), [#allocation5], 16  }
 0x164   : > { %684 = vsyncadd (%p493_p7), [#allocation5], 4294967280 }
 0x165   : > { %339 = sfence }
 0x166 PF: > { %s20_s17 = sadd.s32 1, %s707_s17   ;;  %s980_s12 = smov %s691_s13 }
 0x167   : > { %p17_p0 = scmp.ge.s32.totalorder %s20_s17, 4   ;;  %s981_s13 = smov %s695_s14 }
 0x168   : > { %s982_s14 = smov %s784_s23  ;;  %s983_s15 = smov %s703_s16 }
 0x169   : > { %s984_s16 = smov %s986_s19  ;;  %19 = sbr.rel (!%p17_p0) target bundleno = 7 (0x7), region = 102 }
 0x170   :  { %345 = vsyncpa [#allocation4], 1 }
 0x171   :  { %347 = vsyncpa [#allocation4 + $0x1], 1 }
 0x172   :  { %348 = vsyncpa [#allocation7], 1 }
 0x173   :  { %350 = vsyncpa [#allocation7 + $0x1], 1 }
 0x174   :  { %351 = vsyncpa [#allocation5], 1 }
 0x175   :  { %353 = vsyncpa [#allocation5 + $0x1], 1 }

</bundles_post_ra>
